<compile_context>
chip_gen: v7x
topology: tpu7x:2x2x1
jax: 0.10.0
libtpu: 0.0.40
codegen_flags: <defaults>
</compile_context>

<pallas_src>
import functools
import math

import jax
import jax.numpy as jnp
from jax import lax
from jax.experimental import pallas as pl
from jax.experimental.pallas import tpu as pltpu

EPS = 1e-5


def _round_up(x, m):
    return (x + m - 1) // m * m


# ---------------------------------------------------------------------------
# Mish epilogue: y * tanh(softplus(y)) with a single exp.
#   t = exp(-|y|)
#     y >= 0: tanh(softplus(y)) = (1 + 2t) / (1 + 2t + 2t^2)
#     y <  0: tanh(softplus(y)) = (2t + t^2) / (2 + 2t + t^2)
# (den >= 1 always, so the division is safe.)
# ---------------------------------------------------------------------------
def _mish_from_linear(y):
    t = jnp.exp(-jnp.abs(y))
    t2 = t * t
    pos = y >= 0.0
    num = 2.0 * t + jnp.where(pos, 1.0, t2)
    den = num + jnp.where(pos, 2.0 * t2, 2.0)
    return y * num / den


# ---------------------------------------------------------------------------
# Fused GEMM + bias + Mish kernels
# ---------------------------------------------------------------------------
def _gemm_bias_mish_kernel(a_ref, w_ref, b_ref, o_ref):
    # K fits a single block: one wide MXU contraction, no accumulator scratch.
    y = jnp.dot(a_ref[...], w_ref[...], preferred_element_type=jnp.float32)
    y = y + b_ref[...]
    o_ref[...] = _mish_from_linear(y).astype(o_ref.dtype)


def _gemm_bias_mish_kernel_acc(a_ref, w_ref, b_ref, o_ref, acc_ref):
    # K split across the innermost grid axis; f32 accumulation in VMEM scratch.
    k = pl.program_id(2)

    @pl.when(k == 0)
    def _init():
        acc_ref[...] = jnp.zeros_like(acc_ref)

    acc_ref[...] += jnp.dot(a_ref[...], w_ref[...],
                            preferred_element_type=jnp.float32)

    @pl.when(k == pl.num_programs(2) - 1)
    def _finalize():
        y = acc_ref[...] + b_ref[...]
        o_ref[...] = _mish_from_linear(y).astype(o_ref.dtype)


def _matmul_bias_mish(a, w, bias, out_dtype=jnp.float32):
    """a: (M, K) bf16 im2col patches, w: (K, N) bf16 BN-folded weights, bias: (N,) f32."""
    m, k = a.shape
    k2, n = w.shape
    assert k == k2

    # --- N: lane-dense (multiple of 128); prefer 256-wide tiles when they divide.
    n128 = _round_up(n, 128)
    tn = 256 if (n128 % 256 == 0) else 128
    tn = min(tn, n128)
    np_ = n128

    # --- K: one block when small enough, else 1024-deep chunks + accumulator.
    k128 = _round_up(k, 128)
    if k128 <= 2048:
        tk, kp = k128, k128
    else:
        tk = 1024
        kp = _round_up(k, tk)
    nk = kp // tk

    # --- M: multiple of 16 (bf16 sublane packing), up to 512 rows per block.
    tm = 512 if m >= 512 else _round_up(m, 16)
    mp = _round_up(m, tm)
    ni = mp // tm
    nj = np_ // tn
    if ni == 1 and nj == 1 and tm % 32 == 0:
        # Give the megacore (v7x: 2 TCs) at least two parallel grid steps.
        tm //= 2
        mp = _round_up(m, tm)
        ni = mp // tm

    a_p = jnp.pad(a, ((0, mp - m), (0, kp - k)))
    w_p = jnp.pad(w, ((0, kp - k), (0, np_ - n)))
    b_p = jnp.pad(bias.reshape(1, n).astype(jnp.float32),
                  ((0, 0), (0, np_ - n)))

    if nk == 1:
        out = pl.pallas_call(
            _gemm_bias_mish_kernel,
            out_shape=jax.ShapeDtypeStruct((mp, np_), out_dtype),
            grid=(nj, ni),                      # cout-block outermost -> weights resident
            in_specs=[
                pl.BlockSpec((tm, tk), lambda j, i: (i, 0)),
                pl.BlockSpec((tk, tn), lambda j, i: (0, j)),
                pl.BlockSpec((1, tn), lambda j, i: (0, j)),
            ],
            out_specs=pl.BlockSpec((tm, tn), lambda j, i: (i, j)),
            compiler_params=pltpu.CompilerParams(
                dimension_semantics=("parallel", "parallel")),
        )(a_p, w_p, b_p)
    else:
        out = pl.pallas_call(
            _gemm_bias_mish_kernel_acc,
            out_shape=jax.ShapeDtypeStruct((mp, np_), out_dtype),
            grid=(nj, ni, nk),
            in_specs=[
                pl.BlockSpec((tm, tk), lambda j, i, kk: (i, kk)),
                pl.BlockSpec((tk, tn), lambda j, i, kk: (kk, j)),
                pl.BlockSpec((1, tn), lambda j, i, kk: (0, j)),
            ],
            out_specs=pl.BlockSpec((tm, tn), lambda j, i, kk: (i, j)),
            scratch_shapes=[pltpu.VMEM((tm, tn), jnp.float32)],
            compiler_params=pltpu.CompilerParams(
                dimension_semantics=("parallel", "parallel", "arbitrary")),
        )(a_p, w_p, b_p)

    return out[:m, :n]


# ---------------------------------------------------------------------------
# BasicConv = Conv2d(bias=False, pad=k//2) + BatchNorm2d(eval) + Mish
# ---------------------------------------------------------------------------
def basic_conv(x, params, stride=1):
    """x: (N, H, W, Cin) float32 NHWC; params['w']: (KH, KW, Cin, Cout) HWIO."""
    w = params["w"]
    kh, kw, cin, cout = w.shape
    n, h, wdt, cin_x = x.shape
    assert cin_x == cin
    pad = kh // 2
    h_out = (h + 2 * pad - kh) // stride + 1
    w_out = (wdt + 2 * pad - kw) // stride + 1

    # Fold BN (inference) scale into the conv weights; bias added in the epilogue.
    scale = params["gamma"] * lax.rsqrt(params["var"] + EPS)
    bias = (params["beta"] - params["mean"] * scale).astype(jnp.float32)
    w_mat = (w * scale[None, None, None, :]).reshape(kh * kw * cin, cout)
    w_mat = w_mat.astype(jnp.bfloat16)

    # Host-side im2col, emitted directly in bf16 (halves staging traffic).
    xb = x.astype(jnp.bfloat16)
    xp = jnp.pad(xb, ((0, 0), (pad, pad), (pad, pad), (0, 0)))
    patches = [
        xp[:, dh:dh + stride * h_out:stride, dw:dw + stride * w_out:stride, :]
        for dh in range(kh) for dw in range(kw)
    ]
    a = jnp.concatenate(patches, axis=-1) if len(patches) > 1 else patches[0]
    a = a.reshape(n * h_out * w_out, kh * kw * cin)

    y = _matmul_bias_mish(a, w_mat, bias)
    return y.reshape(n, h_out, w_out, cout)


# ---------------------------------------------------------------------------
# Pure-JAX reference (matched bf16 operand precision, exact Mish)
# ---------------------------------------------------------------------------
def basic_conv_ref(x, params, stride=1):
    w = params["w"]
    kh = w.shape[0]
    pad = kh // 2
    scale = params["gamma"] * lax.rsqrt(params["var"] + EPS)
    bias = params["beta"] - params["mean"] * scale
    w_scaled = (w * scale[None, None, None, :]).astype(jnp.bfloat16)
    y = lax.conv_general_dilated(
        x.astype(jnp.bfloat16), w_scaled,
        window_strides=(stride, stride),
        padding=[(pad, pad), (pad, pad)],
        dimension_numbers=("NHWC", "HWIO", "NHWC"),
        preferred_element_type=jnp.float32)
    y = y + bias
    return y * jnp.tanh(jax.nn.softplus(y))


def init_basic_conv(key, cin, cout, k):
    kw_, kb, km, kv, kg = jax.random.split(key, 5)
    fan = k * k * cout
    return {
        "w": jax.random.normal(kw_, (k, k, cin, cout), jnp.float32)
             * math.sqrt(2.0 / fan),
        "gamma": 0.5 + jax.random.uniform(kg, (cout,), jnp.float32),
        "beta": 0.1 * jax.random.normal(kb, (cout,), jnp.float32),
        "mean": 0.1 * jax.random.normal(km, (cout,), jnp.float32),
        "var": 0.5 + jax.random.uniform(kv, (cout,), jnp.float32),
    }


# ---------------------------------------------------------------------------
if __name__ == "__main__":
    kx, k1, k2 = jax.random.split(jax.random.PRNGKey(0), 3)

    # Small shapes consistent with the module: batch=2, Cin=4, 16x16 spatial,
    # Cout=32, kernel_size=3.  NHWC (2,16,16,4) == NCHW (2,4,16,16) in PyTorch.
    x = jax.random.normal(kx, (2, 16, 16, 4), jnp.float32)

    p1 = init_basic_conv(k1, 4, 32, 3)      # stride=1 (module default)
    p2 = init_basic_conv(k2, 4, 32, 3)      # stride=2 (downsampling variant)

    conv_s1 = jax.jit(functools.partial(basic_conv, stride=1))
    conv_s2 = jax.jit(functools.partial(basic_conv, stride=2))

    y1 = conv_s1(x, p1)
    y2 = conv_s2(x, p2)
    jax.block_until_ready((y1, y2))

    assert y1.shape == (2, 16, 16, 32), y1.shape
    assert y2.shape == (2, 8, 8, 32), y2.shape
    assert bool(jnp.all(jnp.isfinite(y1))) and bool(jnp.all(jnp.isfinite(y2)))

    r1 = basic_conv_ref(x, p1, stride=1)
    r2 = basic_conv_ref(x, p2, stride=2)
    err1 = float(jnp.max(jnp.abs(y1 - r1)))
    err2 = float(jnp.max(jnp.abs(y2 - r2)))
    assert err1 < 5e-2, err1
    assert err2 < 5e-2, err2

    print("KERNEL_OK")
</pallas_src>

<mosaic_0001>
module attributes {stable_mosaic.version = 11 : i64} {
  func.func @_gemm_bias_mish_kernel(%arg0: i32, %arg1: i32, %arg2: memref<256x128xbf16, #tpu.memory_space<vmem>>, %arg3: memref<128x128xbf16, #tpu.memory_space<vmem>>, %arg4: memref<1x128xf32, #tpu.memory_space<vmem>>, %arg5: memref<256x128xf32, #tpu.memory_space<vmem>>) attributes {dimension_semantics = [#tpu.dimension_semantics<parallel>, #tpu.dimension_semantics<parallel>], iteration_bounds = array<i64: 1, 2>, scalar_prefetch = 0 : i64, scratch_operands = 0 : i64, tpu.core_type = #tpu.core_type<tc>, window_params = [{transform_indices = @transform_0, window_bounds = array<i64: 256, 128>}, {transform_indices = @transform_1, window_bounds = array<i64: 128, 128>}, {transform_indices = @transform_2, window_bounds = array<i64: 1, 128>}, {transform_indices = @transform_3, window_bounds = array<i64: 256, 128>}]} {
    %c0 = arith.constant 0 : index
    %c0_0 = arith.constant 0 : index
    %0 = vector.load %arg2[%c0, %c0_0] : memref<256x128xbf16, #tpu.memory_space<vmem>>, vector<256x128xbf16>
    %c0_1 = arith.constant 0 : index
    %c0_2 = arith.constant 0 : index
    %1 = vector.load %arg3[%c0_1, %c0_2] : memref<128x128xbf16, #tpu.memory_space<vmem>>, vector<128x128xbf16>
    %cst = arith.constant dense<0.000000e+00> : vector<256x128xf32>
    %2 = tpu.matmul %0, %1, %cst {dimension_numbers = #tpu.dot_dimension_numbers<[1], [0], [0], [1], [0, 0, 1, 1], [], []>} : vector<256x128xbf16>, vector<128x128xbf16>, vector<256x128xf32> -> vector<256x128xf32>
    %c0_3 = arith.constant 0 : index
    %c0_4 = arith.constant 0 : index
    %3 = vector.load %arg4[%c0_3, %c0_4] : memref<1x128xf32, #tpu.memory_space<vmem>>, vector<1x128xf32>
    %4 = vector.broadcast %3 : vector<1x128xf32> to vector<256x128xf32>
    %5 = arith.addf %2, %4 : vector<256x128xf32>
    %6 = math.absf %5 : vector<256x128xf32>
    %cst_5 = arith.constant 0.000000e+00 : f32
    %7 = vector.broadcast %cst_5 : f32 to vector<256x128xf32>
    %8 = arith.subf %7, %6 : vector<256x128xf32>
    %9 = math.exp %8 : vector<256x128xf32>
    %10 = arith.mulf %9, %9 : vector<256x128xf32>
    %cst_6 = arith.constant 0.000000e+00 : f32
    %11 = vector.broadcast %cst_6 : f32 to vector<256x128xf32>
    %12 = arith.cmpf oge, %5, %11 : vector<256x128xf32>
    %cst_7 = arith.constant 2.000000e+00 : f32
    %13 = vector.broadcast %cst_7 : f32 to vector<256x128xf32>
    %14 = arith.mulf %13, %9 : vector<256x128xf32>
    %cst_8 = arith.constant 1.000000e+00 : f32
    %15 = vector.broadcast %cst_8 : f32 to vector<256x128xf32>
    %16 = arith.select %12, %15, %10 : vector<256x128xi1>, vector<256x128xf32>
    %17 = arith.addf %14, %16 : vector<256x128xf32>
    %cst_9 = arith.constant 2.000000e+00 : f32
    %18 = vector.broadcast %cst_9 : f32 to vector<256x128xf32>
    %19 = arith.mulf %18, %10 : vector<256x128xf32>
    %cst_10 = arith.constant 2.000000e+00 : f32
    %20 = vector.broadcast %cst_10 : f32 to vector<256x128xf32>
    %21 = arith.select %12, %19, %20 : vector<256x128xi1>, vector<256x128xf32>
    %22 = arith.addf %17, %21 : vector<256x128xf32>
    %23 = arith.mulf %5, %17 : vector<256x128xf32>
    %24 = arith.divf %23, %22 : vector<256x128xf32>
    %c0_11 = arith.constant 0 : index
    %c0_12 = arith.constant 0 : index
    %25 = vector.load %arg5[%c0_11, %c0_12] : memref<256x128xf32, #tpu.memory_space<vmem>>, vector<256x128xf32>
    tpu.vector_store %arg5[%c0_11, %c0_12], %24 {strides = array<i32>} : memref<256x128xf32, #tpu.memory_space<vmem>>, vector<256x128xf32>,
    return
  }
  func.func @transform_0(%arg0: i32, %arg1: i32) -> (i32, i32) {
    %c0_i32 = arith.constant 0 : i32
    %c0_i32_0 = arith.constant 0 : i32
    return %arg1, %c0_i32 : i32, i32
  }
  func.func @transform_1(%arg0: i32, %arg1: i32) -> (i32, i32) {
    %c0_i32 = arith.constant 0 : i32
    %c0_i32_0 = arith.constant 0 : i32
    return %c0_i32, %arg0 : i32, i32
  }
  func.func @transform_2(%arg0: i32, %arg1: i32) -> (i32, i32) {
    %c0_i32 = arith.constant 0 : i32
    %c0_i32_0 = arith.constant 0 : i32
    return %c0_i32, %arg0 : i32, i32
  }
  func.func @transform_3(%arg0: i32, %arg1: i32) -> (i32, i32) {
    %c0_i32 = arith.constant 0 : i32
    return %arg1, %arg0 : i32, i32
  }
}

</mosaic_0001>

<bundles_post_ra>
// kernel: basic_conv.1
= control target key start
LH: loop header
LB: loop body
LE: loop exit
PB: predicated region body
PF: predicated region fallthrough
CT: control target
= control target key end

     0   :  { %8 = vsyncpa [#allocation3], 0  ;;  %s2223_s0 = inlined_call_operand.vmem [shape: bf16[512,128], index: 0, kind: input, shape index: {}]   ;;  %s2224_s1 = inlined_call_operand.vmem [shape: bf16[128,128], index: 1, kind: input, shape index: {}]   ;;  %s2225_s2 = inlined_call_operand.vmem [shape: f32[1,128], index: 2, kind: input, shape index: {}]   ;;  %s2226_s3 = inlined_call_operand.hbm [shape: f32[512,128], index: 3, kind: output, shape index: {}]  }
   0x1   :  { %10 = vsyncpa [#allocation3 + $0x1], 0  ;;  %s1646_s12 = smov 0   ;;  %s1648_s13 = smov 0  }
   0x2   :  { %s1650_s14 = smov 0   ;;  %s1652_s15 = smov 0  }
   0x3   :  { %s1654_s16 = smov 0   ;;  %s1656_s17 = smov 0  }
   0x4 LB: > { %s1204_s18 = sadd.s32 4294967295, %s1621_s17   ;;  %s1205_s19 = sadd.s32 4294967294, %s1621_s17   ;;  %s1621_s17 = sphi %s1656_s17, %s16_s17   ;;  %s1617_s16 = sphi %s1654_s16, %s2233_s16   ;;  %s1613_s15 = sphi %s1652_s15, %s2232_s15   ;;  %s1609_s14 = sphi %s1650_s14, %s2231_s14   ;;  %s1605_s13 = sphi %s1648_s13, %s2230_s13   ;;  %s1601_s12 = sphi %s1646_s12, %s2229_s12  }
   0x5   : > { %s25_s20 = sadd.s32 1, %s1617_s16  ;;  %s115_s21 = sadd.s32 1, %s1609_s14 }
   0x6   : > { %p26_p0 = scmp.ge.s32.totalorder %s25_s20, 2  ;;  %p125_p1 = scmp.ne.s32.totalorder %s1609_s14, %s1605_s13 }
   0x7   : > { %p126_p2 = scmp.eq.s32.totalorder %s1204_s18, 1  ;;  %p131_p3 = scmp.ne.s32.totalorder %s1605_s13, %s1601_s12 }
   0x8   : > { %s2235_s20 = smov (%p26_p0, %s25_s20), 0  ;;  %p132_p5 = scmp.eq.s32.totalorder %s1205_s19, 1 }
   0x9   : > { %p1686_p4 = por %p126_p2, %p125_p1  ;;  %s110_s23 = ssub.s32 %s1617_s16, %s2235_s20 }
   0xa   : > { %p1210_p6 = scmp.ge.s32.totalorder %s1621_s17, 1  ;;  %p113_p7 = scmp.eq.s32.totalorder %s110_s23, 0 }
   0xb   : > { %p1693_p8 = por %p132_p5, %p131_p3  ;;  %p172_p9 = scmp.lt.s32.totalorder %s1621_s17, 3 }
   0xc   : > { %s1699_s25 = scalar_select %p113_p7, %s1609_s14, %s115_s21  }
   0xd   : > { %p173_p10 = pnand %p1210_p6, %p172_p9 }
   0xe   : > { %v1390_v0 = vld [vmem:[%s2224_s1] sm:$0xff] (!%p173_p10)   ;;  %s1212_s28 = sshll.u32 (!%p173_p10), %s1613_s15, 5  ;;  %v1391_v1 = vld [vmem:[%s2224_s1 + $0x8] sm:$0xff] (!%p173_p10)   ;;  %v1392_v2 = vld [vmem:[%s2224_s1 + $0x10] sm:$0xff] (!%p173_p10)   ;;  %s200_s5 = sand.u32 (!%p173_p10), 1, %s1605_s13  }
   0xf   : > { %176 = sbr.rel (%p173_p10) target bundleno = 421 (0x1a5), region = 32  ;;  %p204_p11 = scmp.lt.s32.totalorder (!%p173_p10), %s1212_s28, 63  ;;  %1269 = vmatprep.subr.bf16.mxu0 (!%p173_p10), %v1390_v0  ;;  %1317 = vmatprep.subr.bf16.mxu1 (!%p173_p10), %v1390_v0  ;;  %v1393_v3 = vld [vmem:[%s2224_s1 + $0x18] sm:$0xff] (!%p173_p10)   ;;  %v1394_v6 = vld [vmem:[%s2224_s1 + $0x20] sm:$0xff] (!%p173_p10)   ;;  %v1395_v7 = vld [vmem:[%s2224_s1 + $0x28] sm:$0xff] (!%p173_p10)  }
  0x10   : > { %1270 = vmatpush3.bf16.msra.mxu0 (!%p173_p10), %v1390_v0  ;;  %1325 = vmatpush3.bf16.msra.mxu1 (!%p173_p10), %v1390_v0  ;;  %v1396_v8 = vld [vmem:[%s2224_s1 + $0x30] sm:$0xff] (!%p173_p10)   ;;  %v1397_v9 = vld [vmem:[%s2224_s1 + $0x38] sm:$0xff] (!%p173_p10)   ;;  %v1750_v24 = vld [vmem:[%s2225_s2] ss:$0 sm:$0xff] (!%p173_p10)  ;;  %s1244_s10 = sshll.u32 (!%p173_p10), %s1613_s15, 12  ;;  %s2177_s15 = scalar_lea.sflag (!%p173_p10), [#allocation3], %s200_s5 }
  0x11   : > { %1271 = vmatprep.subr.bf16.mxu0 (!%p173_p10), %v1391_v1  ;;  %1318 = vmatprep.subr.bf16.mxu1 (!%p173_p10), %v1391_v1  ;;  %s2169_s21 = scalar_lea.hbm (!%p173_p10), %s2226_s3, %s1244_s10  ;;  %s1623_s26 = smov (!%p173_p10), [#allocation2]  }
  0x12   : > { %s1547_s27 = sshll.u32 (!%p173_p10), %s1623_s26, 4  ;;  %s1548_s27 = int_to_ptr.vmem [resolvable:$false] %s1547_s27 }
  0x14   : > { %1272 = vmatpush3.bf16.msra.mxu0 (!%p173_p10), %v1391_v1  ;;  %1326 = vmatpush3.bf16.msra.mxu1 (!%p173_p10), %v1391_v1 }
  0x15   : > { %1273 = vmatprep.subr.bf16.mxu0 (!%p173_p10), %v1392_v2  ;;  %1319 = vmatprep.subr.bf16.mxu1 (!%p173_p10), %v1392_v2 }
  0x16   : > { %s2237_s28 = smov (!%p204_p11, %s1212_s28), 63 }
  0x17   : > { %s1213_s6 = sshll.u32 %s2237_s28, 2  ;;  %s1549_s28 = scalar_lea.vmem %s1548_s27, 8192 }
  0x18   : > { %s1714_s9 = scalar_lea.vmem %s2223_s0, %s1213_s6  ;;  %1274 = vmatpush3.bf16.msra.mxu0 %v1392_v2  ;;  %1327 = vmatpush3.bf16.msra.mxu1 %v1392_v2  ;;  %s1211_s6 = sshll.u32 %s200_s5, 8 }
  0x19   : > { %v1398_v4 = vld [vmem:[%s1714_s9] sm:$0xff]   ;;  %1275 = vmatprep.subr.bf16.mxu0 %v1393_v3  ;;  %1320 = vmatprep.subr.bf16.mxu1 %v1393_v3  ;;  %v1400_v10 = vld [vmem:[%s1714_s9 + $0x8] sm:$0xff]   ;;  %v1402_v12 = vld [vmem:[%s1714_s9 + $0x10] sm:$0xff]   ;;  %s1907_s7 = scalar_lea.vmem [#allocation2], %s1211_s6 }
  0x1a   : > { %v1399_v5 = vld [vmem:[%s1714_s9 + $0x40] sm:$0xff]   ;;  %1285 = vmatprep.mubr.bf16.mxu0 %v1398_v4  ;;  %v1401_v11 = vld [vmem:[%s1714_s9 + $0x48] sm:$0xff]   ;;  %v1403_v13 = vld [vmem:[%s1714_s9 + $0x50] sm:$0xff]   ;;  %s1105_s11 = sshll.u32 %s1907_s7, 4  ;;  %s2171_s11 = int_to_ptr.vmem [resolvable:$true] %s1105_s11 }
  0x1b   : > { %1301 = vmatprep.mubr.bf16.mxu1 %v1399_v5  ;;  %v1404_v14 = vld [vmem:[%s1714_s9 + $0x18] sm:$0xff]   ;;  %v1406_v16 = vld [vmem:[%s1714_s9 + $0x20] sm:$0xff]   ;;  %v1408_v18 = vld [vmem:[%s1714_s9 + $0x28] sm:$0xff]   ;;  %s1543_s23 = scalar_lea.vmem %s2171_s11, 4096  ;;  %p1550_p1 = scmp.lt.s32.totalorder %s2171_s11, %s1548_s27 }
  0x1c   : > { %1276 = vmatpush3.bf16.msra.mxu0 %v1393_v3  ;;  %1328 = vmatpush3.bf16.msra.mxu1 %v1393_v3  ;;  %v1405_v15 = vld [vmem:[%s1714_s9 + $0x58] sm:$0xff]   ;;  %v1407_v17 = vld [vmem:[%s1714_s9 + $0x60] sm:$0xff]   ;;  %v1409_v19 = vld [vmem:[%s1714_s9 + $0x68] sm:$0xff]   ;;  %p1544_p12 = scmp.ne.s32.totalorder %s2171_s11, %s1543_s23  ;;  %p1551_p2 = scmp.lt.s32.totalorder %s1549_s28, %s1543_s23 }
  0x1d   : > { %1277 = vmatprep.subr.bf16.mxu0 %v1394_v6  ;;  %1321 = vmatprep.subr.bf16.mxu1 %v1394_v6  ;;  %v1410_v20 = vld [vmem:[%s1714_s9 + $0x30] sm:$0xff]   ;;  %v1412_v22 = vld [vmem:[%s1714_s9 + $0x38] sm:$0xff]  }
  0x1e   : > { %v1411_v21 = vld [vmem:[%s1714_s9 + $0x70] sm:$0xff]   ;;  %v1413_v23 = vld [vmem:[%s1714_s9 + $0x78] sm:$0xff]   ;;  %p1545_p13 = pnand %p1544_p12, %p1686_p4  ;;  %p1552_p3 = por %p1551_p2, %p1550_p1 }
  0x20   : > { %1278 = vmatpush3.bf16.msra.mxu0 %v1394_v6  ;;  %1329 = vmatpush3.bf16.msra.mxu1 %v1394_v6  ;;  %p1546_p0 = pneg %p1545_p13 }
  0x21   : > { %1279 = vmatprep.subr.bf16.mxu0 %v1395_v7  ;;  %1322 = vmatprep.subr.bf16.mxu1 %v1395_v7 }
  0x22   : > { %p1553_p5 = pnand %p1552_p3, %p1546_p0 }
  0x24   : > { %1280 = vmatpush3.bf16.msra.mxu0 %v1395_v7  ;;  %1330 = vmatpush3.bf16.msra.mxu1 %v1395_v7 }
  0x25   : > { %1281 = vmatprep.subr.bf16.mxu0 %v1396_v8  ;;  %1323 = vmatprep.subr.bf16.mxu1 %v1396_v8 }
  0x28   : > { %1282 = vmatpush3.bf16.msra.mxu0 %v1396_v8  ;;  %1331 = vmatpush3.bf16.msra.mxu1 %v1396_v8 }
  0x29   : > { %1283 = vmatprep.subr.bf16.mxu0 %v1397_v9  ;;  %1324 = vmatprep.subr.bf16.mxu1 %v1397_v9 }
  0x2c   : > { %1284 = vmatpush3.bf16.msra.mxu0 %v1397_v9  ;;  %1332 = vmatpush3.bf16.msra.mxu1 %v1397_v9 }
  0x2f   : > { %1286 = vmatmul.mubr.bf16.vlgmr.msra.gmra.mrb[0].mxu0 %v1400_v10  ;;  %1302 = vmatmul.mubr.bf16.vlgmr.msra.gmra.mrb[0].mxu1 %v1401_v11 }
  0x30   : > { %1289 = vmatprep.mubr.bf16.mxu0 %v1402_v12  ;;  %1305 = vmatprep.mubr.bf16.mxu1 %v1403_v13 }
  0x37   : > { %1290 = vmatmul.mubr.bf16.gmra.mrb[4].mxu0 %v1404_v14  ;;  %1306 = vmatmul.mubr.bf16.gmra.mrb[4].mxu1 %v1405_v15 }
  0x38   : > { %1293 = vmatprep.mubr.bf16.mxu0 %v1406_v16  ;;  %1309 = vmatprep.mubr.bf16.mxu1 %v1407_v17 }
  0x3f   : > { %1294 = vmatmul.mubr.bf16.gmra.mrb[8].mxu0 %v1408_v18  ;;  %1310 = vmatmul.mubr.bf16.gmra.mrb[8].mxu1 %v1409_v19 }
  0x40   : > { %1297 = vmatprep.mubr.bf16.mxu0 %v1410_v20  ;;  %1313 = vmatprep.mubr.bf16.mxu1 %v1411_v21 }
  0x47   : > { %1298 = vmatmul.mubr.bf16.gmra.mrb[12].mxu0 %v1412_v22  ;;  %1314 = vmatmul.mubr.bf16.gmra.mrb[12].mxu1 %v1413_v23 }
 0x102   : > { %v1287_v25 = vpop.f32.mrb[0].mxu0  ;;  %v1303_v26 = vpop.f32.mrb[0].mxu1 }
 0x103   : > { %v1753_v27 = vadd.f32 %v1287_v25, %v1750_v24  ;;  %v1756_v28 = vadd.f32 %v1303_v26, %v1750_v24  ;;  %v451_v29 = vpop.f32.mrb[1].mxu0  ;;  %v515_v30 = vpop.f32.mrb[1].mxu1 }
 0x104   : > { %v1759_v31 = vadd.f32 %v1750_v24, %v451_v29  ;;  %v1762_v32 = vadd.f32 %v1750_v24, %v515_v30  ;;  %v1288_v33 = vpop.f32.mrb[2].mxu0  ;;  %v1304_v34 = vpop.f32.mrb[2].mxu1 }
 0x105   : > { %v580_v35 = vand.u32 2147483647, %v1753_v27  ;;  %v596_v36 = vand.u32 2147483647, %v1756_v28  ;;  %v1769_v41 = vadd.f32 %v1288_v33, %v1750_v24  ;;  %v1772_v42 = vadd.f32 %v1304_v34, %v1750_v24  ;;  %v454_v43 = vpop.f32.mrb[3].mxu0  ;;  %v518_v44 = vpop.f32.mrb[3].mxu1 }
 0x106   : > { %v578_v37 = vand.u32 2147483647, %v1759_v31  ;;  %v594_v38 = vand.u32 2147483647, %v1762_v32  ;;  %v1775_v47 = vadd.f32 %v1750_v24, %v454_v43  ;;  %v1778_v48 = vadd.f32 %v1750_v24, %v518_v44 }
 0x107   : > { %v612_v39 = vsub.f32 0.0, %v580_v35  ;;  %v628_v40 = vsub.f32 0.0, %v596_v36  ;;  %v581_v51 = vand.u32 2147483647, %v1769_v41  ;;  %v597_v55 = vand.u32 2147483647, %v1772_v42 }
 0x108   : > { %v610_v45 = vsub.f32 0.0, %v578_v37  ;;  %v626_v46 = vsub.f32 0.0, %v594_v38  ;;  %v579_v56 = vand.u32 2147483647, %v1775_v47  ;;  %v595_v58 = vand.u32 2147483647, %v1778_v48 }
 0x109   : > { %v646_v49 = vmul.f32 1.442695, %v612_v39  ;;  %v678_v50 = vmul.f32 1.442695, %v628_v40  ;;  %v613_v54 = vsub.f32 0.0, %v581_v51  ;;  %v629_v62 = vsub.f32 0.0, %v597_v55 }
 0x10a   : > { %v642_v52 = vmul.f32 1.442695, %v610_v45  ;;  %v674_v53 = vmul.f32 1.442695, %v626_v46  ;;  %v1291_v57 = vpop.f32.mrb[4].mxu0  ;;  %v1307_v59 = vpop.f32.mrb[4].mxu1 }
 0x10b   : > { %1414 = vpow2.f32 %v646_v49  ;;  %v467_v60 = vpop.f32.mrb[5].mxu0  ;;  %v648_v61 = vmul.f32 1.442695, %v613_v54  ;;  %v611_v63 = vsub.f32 0.0, %v579_v56  ;;  %v531_v0 = vpop.f32.mrb[5].mxu1  ;;  %v627_v2 = vsub.f32 0.0, %v595_v58 }
 0x10c   : > { %1416 = vpow2.f32 %v678_v50  ;;  %v1292_v1 = vpop.f32.mrb[6].mxu0  ;;  %v1785_v3 = vadd.f32 %v1291_v57, %v1750_v24  ;;  %v1788_v4 = vadd.f32 %v1307_v59, %v1750_v24  ;;  %v1308_v5 = vpop.f32.mrb[6].mxu1  ;;  %v680_v7 = vmul.f32 1.442695, %v629_v62 }
 0x10d   : > { %1418 = vpow2.f32 %v642_v52  ;;  %v1790_v6 = vpop.f32.mrb[7].mxu0  ;;  %v1793_v8 = vadd.f32 %v1750_v24, %v467_v60  ;;  %v1795_v9 = vpop.f32.mrb[7].mxu1  ;;  %v644_v10 = vmul.f32 1.442695, %v611_v63  ;;  %v676_v12 = vmul.f32 1.442695, %v627_v2 }
 0x10e   : > { %1420 = vpow2.f32 %v674_v53  ;;  %v584_v11 = vand.u32 2147483647, %v1785_v3  ;;  %v600_v13 = vand.u32 2147483647, %v1788_v4  ;;  %v1801_v16 = vadd.f32 %v1750_v24, %v531_v0 }
 0x10f   : > { %1422 = vpow2.f32 %v648_v61  ;;  %v582_v14 = vand.u32 2147483647, %v1793_v8  ;;  %vm740_vm0 = vcmp.ge.f32.partialorder %v1753_v27, 0.0  ;;  %vm756_vm1 = vcmp.ge.f32.partialorder %v1756_v28, 0.0 }
 0x110   : > { %1424 = vpow2.f32 %v680_v7  ;;  %v616_v15 = vsub.f32 0.0, %v584_v11  ;;  %v632_v19 = vsub.f32 0.0, %v600_v13  ;;  %vm738_vm2 = vcmp.ge.f32.partialorder %v1759_v31, 0.0 }
 0x111   : > { %v614_v20 = vsub.f32 0.0, %v582_v14  ;;  %1426 = vpow2.f32 %v644_v10  ;;  %vm754_vm3 = vcmp.ge.f32.partialorder %v1762_v32, 0.0  ;;  %v598_v26 = vand.u32 2147483647, %v1801_v16 }
 0x112   : > { %v1803_v17 = vpop.f32.mrb[8].mxu0  ;;  %v1805_v18 = vpop.f32.mrb[8].mxu1  ;;  %v654_v23 = vmul.f32 1.442695, %v616_v15  ;;  %1428 = vpow2.f32 %v676_v12  ;;  %v1817_v29 = vadd.f32 %v1292_v1, %v1750_v24  ;;  %v686_v35 = vmul.f32 1.442695, %v632_v19 }
 0x113   : > { %v1808_v21 = vpop.f32.mrb[9].mxu0  ;;  %v1810_v22 = vpop.f32.mrb[9].mxu1  ;;  %v1820_v36 = vadd.f32 %v1308_v5, %v1750_v24  ;;  %vm741_vm4 = vcmp.ge.f32.partialorder %v1769_v41, 0.0  ;;  %v1827_v44 = vmul.f32 1.442695, %v614_v20  ;;  %vm757_vm5 = vcmp.ge.f32.partialorder %v1772_v42, 0.0 }
 0x114   : > { %v1822_v37 = vpop.f32.mrb[10].mxu0  ;;  %v1824_v38 = vpop.f32.mrb[10].mxu1  ;;  %1430 = vpow2.f32 %v654_v23  ;;  %vm739_vm6 = vcmp.ge.f32.partialorder %v1775_v47, 0.0  ;;  %v585_v7 = vand.u32 2147483647, %v1817_v29  ;;  %vm755_vm7 = vcmp.ge.f32.partialorder %v1778_v48, 0.0 }
 0x115   : > { %v1415_v25 = vpop.eup %1414  ;;  %v1829_v45 = vpop.f32.mrb[11].mxu0  ;;  %1432 = vpow2.f32 %v686_v35  ;;  %vm744_vm8 = vcmp.ge.f32.partialorder %v1785_v3, 0.0  ;;  %vm760_vm9 = vcmp.ge.f32.partialorder %v1788_v4, 0.0  ;;  %vm742_vm10 = vcmp.ge.f32.partialorder %v1793_v8, 0.0 }
 0x116   : > { %v1417_v30 = vpop.eup %1416  ;;  %v708_v33 = vmul.f32 %v1415_v25, %v1415_v25  ;;  %v772_v34 = vmul.f32 2.0, %v1415_v25  ;;  %v1831_v46 = vpop.f32.mrb[11].mxu1  ;;  %vm758_vm11 = vcmp.ge.f32.partialorder %v1801_v16, 0.0  ;;  %vm745_vm12 = vcmp.ge.f32.partialorder %v1817_v29, 0.0 }
 0x117   : > { %v1419_v39 = vpop.eup %1418  ;;  %v724_v40 = vmul.f32 %v1417_v30, %v1417_v30  ;;  %v788_v43 = vmul.f32 2.0, %v1417_v30  ;;  %v1865_v30 = vsub.f32 0.0, %v598_v26  ;;  %vm761_vm13 = vcmp.ge.f32.partialorder %v1820_v36, 0.0 }
 0x118   : > { %v1421_v49 = vpop.eup %1420  ;;  %v804_v50 = vsel %vm740_vm0, 1.0, %v708_v33  ;;  %v868_v51 = vmul.f32 2.0, %v708_v33  ;;  %v706_v52 = vmul.f32 %v1419_v39, %v1419_v39  ;;  %v770_v53 = vmul.f32 2.0, %v1419_v39 }
 0x119   : > { %v836_v54 = vadd.f32 %v804_v50, %v772_v34  ;;  %v820_v55 = vsel %vm756_vm1, 1.0, %v724_v40  ;;  %v884_v56 = vmul.f32 2.0, %v724_v40  ;;  %v722_v57 = vmul.f32 %v1421_v49, %v1421_v49  ;;  %v1423_v0 = vpop.eup %1422 }
 0x11a   : > { %v900_v58 = vsel %vm740_vm0, %v868_v51, 2.0  ;;  %v852_v59 = vadd.f32 %v820_v55, %v788_v43  ;;  %v802_v60 = vsel %vm738_vm2, 1.0, %v706_v52  ;;  %v866_v61 = vmul.f32 2.0, %v706_v52  ;;  %v1842_v62 = vpop.f32.mrb[12].mxu0  ;;  %v1844_v63 = vpop.f32.mrb[12].mxu1 }
 0x11b   : > { %v932_v1 = vadd.f32 %v900_v58, %v836_v54  ;;  %v916_v2 = vsel %vm756_vm1, %v884_v56, 2.0  ;;  %v1848_v5 = vadd.f32 %v802_v60, %v770_v53  ;;  %v1852_v10 = vpop.f32.mrb[13].mxu0  ;;  %v1854_v11 = vpop.f32.mrb[13].mxu1  ;;  %v786_v15 = vmul.f32 2.0, %v1421_v49 }
 0x11c   : > { %v1425_v12 = vpop.eup %1424  ;;  %v948_v13 = vadd.f32 %v916_v2, %v852_v59  ;;  %v898_v14 = vsel %vm738_vm2, %v866_v61, 2.0  ;;  %v1858_v19 = vpop.f32.mrb[14].mxu0  ;;  %v818_v25 = vsel %vm754_vm3, 1.0, %v722_v57  ;;  %v882_v40 = vmul.f32 2.0, %v722_v57 }
 0x11d   : > { %v1860_v20 = vpop.f32.mrb[14].mxu1  ;;  %1434 = vrcp.f32 %v932_v1  ;;  %v930_v23 = vadd.f32 %v898_v14, %v1848_v5  ;;  %v1867_v33 = vpop.f32.mrb[15].mxu0  ;;  %v1871_v35 = vadd.f32 %v818_v25, %v786_v15  ;;  %v709_v43 = vmul.f32 %v1423_v0, %v1423_v0 }
 0x11e   : > { %v1869_v34 = vpop.f32.mrb[15].mxu1  ;;  %v1427_v39 = vpop.eup %1426  ;;  %1436 = vrcp.f32 %v948_v13  ;;  %v773_v50 = vmul.f32 2.0, %v1423_v0  ;;  %v725_v51 = vmul.f32 %v1425_v12, %v1425_v12  ;;  %v789_v52 = vmul.f32 2.0, %v1425_v12 }
 0x11f   : > { %v1429_v49 = vpop.eup %1428  ;;  %1438 = vrcp.f32 %v930_v23  ;;  %v914_v26 = vsel %vm754_vm3, %v882_v40, 2.0  ;;  %v805_v53 = vsel %vm741_vm4, 1.0, %v709_v43  ;;  %v869_v55 = vmul.f32 2.0, %v709_v43 }
 0x120   : > { %v617_v56 = vsub.f32 0.0, %v585_v7  ;;  %v1431_v57 = vpop.eup %1430  ;;  %v946_v58 = vadd.f32 %v914_v26, %v1871_v35  ;;  %v837_v60 = vadd.f32 %v805_v53, %v773_v50  ;;  %v821_v61 = vsel %vm757_vm5, 1.0, %v725_v51 }
 0x121   : > { %v885_v0 = vmul.f32 2.0, %v725_v51  ;;  %v901_v1 = vsel %vm741_vm4, %v869_v55, 2.0  ;;  %v1885_v2 = vadd.f32 %v821_v61, %v789_v52  ;;  %v707_v12 = vmul.f32 %v1427_v39, %v1427_v39  ;;  %v1433_v50 = vpop.eup %1432 }
 0x122   : > { %v771_v13 = vmul.f32 2.0, %v1427_v39  ;;  %v964_v14 = vmul.f32 %v836_v54, %v1753_v27  ;;  %1440 = vrcp.f32 %v946_v58  ;;  %v933_v7 = vadd.f32 %v901_v1, %v837_v60 }
 0x123   : > { %v917_v15 = vsel %vm757_vm5, %v885_v0, 2.0  ;;  %v980_v23 = vmul.f32 %v852_v59, %v1756_v28  ;;  %v803_v40 = vsel %vm739_vm6, 1.0, %v707_v12  ;;  %v867_v43 = vmul.f32 2.0, %v707_v12 }
 0x124   : > { %v949_v25 = vadd.f32 %v917_v15, %v1885_v2  ;;  %1442 = vrcp.f32 %v933_v7  ;;  %v835_v39 = vadd.f32 %v803_v40, %v771_v13  ;;  %v723_v27 = vmul.f32 %v1429_v49, %v1429_v49 }
 0x125   : > { %v787_v54 = vmul.f32 2.0, %v1429_v49  ;;  %v899_v51 = vsel %vm739_vm6, %v867_v43, 2.0  ;;  %v712_v52 = vmul.f32 %v1431_v57, %v1431_v57  ;;  %v776_v26 = vmul.f32 2.0, %v1431_v57 }
 0x126   : > { %1444 = vrcp.f32 %v949_v25  ;;  %v962_v59 = vmul.f32 %v1848_v5, %v1759_v31  ;;  %v931_v53 = vadd.f32 %v899_v51, %v835_v39  ;;  %v819_v55 = vsel %vm755_vm7, 1.0, %v723_v27 }
 0x127   : > { %v1435_v28 = vpop.eup %1434  ;;  %v883_v58 = vmul.f32 2.0, %v723_v27  ;;  %v851_v1 = vadd.f32 %v819_v55, %v787_v54  ;;  %v808_v49 = vsel %vm744_vm8, 1.0, %v712_v52  ;;  %v872_v12 = vmul.f32 2.0, %v712_v52 }
 0x128   : > { %v1437_v61 = vpop.eup %1436  ;;  %v999_v0 = vmul.f32 %v1435_v28, %v964_v14  ;;  %1446 = vrcp.f32 %v931_v53  ;;  %v840_v15 = vadd.f32 %v808_v49, %v776_v26  ;;  %v1914_v25 = vadd.f32 %v1750_v24, %v1790_v6 }
 0x129   : > { %v1439_v13 = vpop.eup %1438  ;;  %v1031_v7 = vmul.f32 %v1437_v61, %v980_v23  ;;  %v915_v57 = vsel %vm755_vm7, %v883_v58, 2.0  ;;  %v904_v14 = vsel %vm744_vm8, %v872_v12, 2.0  ;;  %v978_v23 = vmul.f32 %v1871_v35, %v1762_v32 }
 0x12a   : > { %1060 = vst [vmem:[%s1907_s7 + $0x10] sm:$0xff] %v999_v0  ;;  %v995_v31 = vmul.f32 %v1439_v13, %v962_v59  ;;  %v947_v5 = vadd.f32 %v915_v57, %v851_v1  ;;  %v936_v40 = vadd.f32 %v904_v14, %v840_v15  ;;  %v728_v43 = vmul.f32 %v1433_v50, %v1433_v50 }
 0x12b   : > { %1076 = vst [vmem:[%s1907_s7 + $0x90] sm:$0xff] %v1031_v7  ;;  %v792_v27 = vmul.f32 2.0, %v1433_v50  ;;  %v682_v54 = vmul.f32 1.442695, %v1865_v30  ;;  %v656_v51 = vmul.f32 1.442695, %v617_v56  ;;  %v965_v28 = vmul.f32 %v837_v60, %v1769_v41 }
 0x12c   : > { %1058 = vst [vmem:[%s1907_s7] sm:$0xff] %v995_v31  ;;  %1448 = vrcp.f32 %v947_v5  ;;  %v601_v52 = vand.u32 2147483647, %v1820_v36  ;;  %v1441_v26 = vpop.eup %1440  ;;  %v824_v6 = vsel %vm760_vm9, 1.0, %v728_v43  ;;  %v888_v59 = vmul.f32 2.0, %v728_v43 }
 0x12d   : > { %1450 = vrcp.f32 %v936_v40  ;;  %v1027_v32 = vmul.f32 %v1441_v26, %v978_v23  ;;  %v856_v35 = vadd.f32 %v824_v6, %v792_v27  ;;  %v981_v30 = vmul.f32 %v1885_v2, %v1772_v42 }
 0x12e   : > { %1452 = vpow2.f32 %v1827_v44  ;;  %v633_v50 = vsub.f32 0.0, %v601_v52  ;;  %v1443_v53 = vpop.eup %1442  ;;  %v920_v56 = vsel %vm760_vm9, %v888_v59, 2.0  ;;  %v583_v41 = vand.u32 2147483647, %v1914_v25 }
 0x12f   : > { %1454 = vpow2.f32 %v682_v54  ;;  %1074 = vst [vmem:[%s1907_s7 + $0x80] sm:$0xff] %v1027_v32  ;;  %v1001_v55 = vmul.f32 %v1443_v53, %v965_v28  ;;  %v963_v58 = vmul.f32 %v835_v39, %v1775_v47  ;;  %v952_v61 = vadd.f32 %v920_v56, %v856_v35 }
 0x130   : > { %v1445_v60 = vpop.eup %1444  ;;  %1456 = vpow2.f32 %v656_v51  ;;  %v688_v0 = vmul.f32 1.442695, %v633_v50  ;;  %v615_v49 = vsub.f32 0.0, %v583_v41  ;;  %v1935_v42 = vadd.f32 %v1750_v24, %v1795_v9 }
 0x131   : > { %v1033_v44 = vmul.f32 %v1445_v60, %v981_v30  ;;  %1061 = vst [vmem:[%s1907_s7 + $0x18] sm:$0xff] %v1001_v55  ;;  %1458 = vrcp.f32 %v952_v61  ;;  %v1940_v2 = vadd.f32 %v1803_v17, %v1750_v24  ;;  %v1944_v12 = vadd.f32 %v1805_v18, %v1750_v24 }
 0x132   : > { %v1948_v47 = vadd.f32 %v1750_v24, %v1808_v21  ;;  %v1447_v39 = vpop.eup %1446  ;;  %1460 = vpow2.f32 %v688_v0  ;;  %v652_v9 = vmul.f32 1.442695, %v615_v49  ;;  %v599_v13 = vand.u32 2147483647, %v1935_v42 }
 0x133   : > { %1077 = vst [vmem:[%s1907_s7 + $0x98] sm:$0xff] %v1033_v44  ;;  %v997_v7 = vmul.f32 %v1447_v39, %v963_v58  ;;  %v588_v17 = vand.u32 2147483647, %v1940_v2  ;;  %v604_v57 = vand.u32 2147483647, %v1944_v12  ;;  %v979_v18 = vmul.f32 %v851_v1, %v1778_v48 }
 0x134   : > { %1462 = vpow2.f32 %v652_v9  ;;  %v631_v31 = vsub.f32 0.0, %v599_v13  ;;  %v586_v21 = vand.u32 2147483647, %v1948_v47  ;;  %v968_v14 = vmul.f32 %v840_v15, %v1785_v3 }
 0x135   : > { %1059 = vst [vmem:[%s1907_s7 + $0x8] sm:$0xff] %v997_v7  ;;  %v620_v23 = vsub.f32 0.0, %v588_v17  ;;  %v636_v40 = vsub.f32 0.0, %v604_v57  ;;  %v1961_v43 = vadd.f32 %v1750_v24, %v1810_v22  ;;  %v984_v52 = vmul.f32 %v856_v35, %v1788_v4 }
 0x136   : > { %v1449_v5 = vpop.eup %1448  ;;  %v684_v48 = vmul.f32 1.442695, %v631_v31  ;;  %vm743_vm14 = vcmp.ge.f32.partialorder %v1914_v25, 0.0  ;;  %v618_v6 = vsub.f32 0.0, %v586_v21  ;;  %vm759_vm15 = vcmp.ge.f32.partialorder %v1935_v42, 0.0 }
 0x137   : > { %v1451_v27 = vpop.eup %1450  ;;  %v1029_v54 = vmul.f32 %v1449_v5, %v979_v18  ;;  %v662_v3 = vmul.f32 1.442695, %v620_v23  ;;  %v694_v15 = vmul.f32 1.442695, %v636_v40  ;;  %v602_v53 = vand.u32 2147483647, %v1961_v43 }
 0x138   : > { %v1453_v1 = vpop.eup %1452  ;;  %v1007_v51 = vmul.f32 %v1451_v27, %v968_v14  ;;  %1464 = vpow2.f32 %v684_v48  ;;  %vm748_vm0 = vcmp.ge.f32.partialorder %v1940_v2, 0.0  ;;  %v658_v21 = vmul.f32 1.442695, %v618_v6 }
 0x139   : > { %v1455_v26 = vpop.eup %1454  ;;  %1075 = vst [vmem:[%s1907_s7 + $0x88] sm:$0xff] %v1029_v54  ;;  %v710_v22 = vmul.f32 %v1453_v1, %v1453_v1  ;;  %v774_v28 = vmul.f32 2.0, %v1453_v1  ;;  %1466 = vpow2.f32 %v662_v3  ;;  %v634_v23 = vsub.f32 0.0, %v602_v53 }
 0x13a   : > { %v1457_v59 = vpop.eup %1456  ;;  %1064 = vst [vmem:[%s1907_s7 + $0x30] sm:$0xff] %v1007_v51  ;;  %v726_v32 = vmul.f32 %v1455_v26, %v1455_v26  ;;  %v790_v50 = vmul.f32 2.0, %v1455_v26  ;;  %1468 = vpow2.f32 %v694_v15  ;;  %vm764_vm1 = vcmp.ge.f32.partialorder %v1944_v12, 0.0 }
 0x13b   : > { %v806_v4 = vsel %vm742_vm10, 1.0, %v710_v22  ;;  %v870_v35 = vmul.f32 2.0, %v710_v22  ;;  %v713_v30 = vmul.f32 %v1457_v59, %v1457_v59  ;;  %v777_v56 = vmul.f32 2.0, %v1457_v59  ;;  %v1459_v41 = vpop.eup %1458 }
 0x13c   : > { %v838_v60 = vadd.f32 %v806_v4, %v774_v28  ;;  %v822_v55 = vsel %vm758_vm11, 1.0, %v726_v32  ;;  %v886_v58 = vmul.f32 2.0, %v726_v32  ;;  %v1461_v61 = vpop.eup %1460  ;;  %v1039_v44 = vmul.f32 %v1459_v41, %v984_v52 }
 0x13d   : > { %v902_v0 = vsel %vm742_vm10, %v870_v35, 2.0  ;;  %v854_v49 = vadd.f32 %v822_v55, %v790_v50  ;;  %v809_v39 = vsel %vm745_vm12, 1.0, %v713_v30  ;;  %v873_v18 = vmul.f32 2.0, %v713_v30 }
 0x13e   : > { %v934_v9 = vadd.f32 %v902_v0, %v838_v60  ;;  %v918_v13 = vsel %vm758_vm11, %v886_v58, 2.0  ;;  %v1981_v7 = vadd.f32 %v809_v39, %v777_v56  ;;  %v1463_v17 = vpop.eup %1462  ;;  %1080 = vst [vmem:[%s1907_s7 + $0xb0] sm:$0xff] %v1039_v44  ;;  %v729_v31 = vmul.f32 %v1461_v61, %v1461_v61 }
 0x13f   : > { %v950_v57 = vadd.f32 %v918_v13, %v854_v49  ;;  %v793_v5 = vmul.f32 2.0, %v1461_v61  ;;  %v711_v14 = vmul.f32 %v1463_v17, %v1463_v17  ;;  %v905_v40 = vsel %vm745_vm12, %v873_v18, 2.0 }
 0x140   : > { %1470 = vrcp.f32 %v934_v9  ;;  %v825_v27 = vsel %vm761_vm13, 1.0, %v729_v31  ;;  %v889_v54 = vmul.f32 2.0, %v729_v31  ;;  %v937_v48 = vadd.f32 %v905_v40, %v1981_v7 }
 0x141   : > { %1472 = vrcp.f32 %v950_v57  ;;  %v857_v1 = vadd.f32 %v825_v27, %v793_v5  ;;  %v775_v51 = vmul.f32 2.0, %v1463_v17  ;;  %v807_v52 = vsel %vm743_vm14, 1.0, %v711_v14 }
 0x142   : > { %v1465_v3 = vpop.eup %1464  ;;  %v921_v15 = vsel %vm761_vm13, %v889_v54, 2.0  ;;  %v871_v26 = vmul.f32 2.0, %v711_v14  ;;  %1474 = vpow2.f32 %v658_v21  ;;  %v1997_v22 = vadd.f32 %v1822_v37, %v1750_v24 }
 0x143   : > { %v1467_v28 = vpop.eup %1466  ;;  %1476 = vrcp.f32 %v937_v48  ;;  %v953_v6 = vadd.f32 %v921_v15, %v857_v1  ;;  %v839_v59 = vadd.f32 %v807_v52, %v775_v51  ;;  %v690_v32 = vmul.f32 1.442695, %v634_v23 }
 0x144   : > { %v903_v50 = vsel %vm743_vm14, %v871_v26, 2.0  ;;  %v727_v53 = vmul.f32 %v1465_v3, %v1465_v3  ;;  %v791_v4 = vmul.f32 2.0, %v1465_v3  ;;  %v716_v35 = vmul.f32 %v1467_v28, %v1467_v28  ;;  %v1469_v30 = vpop.eup %1468 }
 0x145   : > { %v966_v56 = vmul.f32 %v838_v60, %v1793_v8  ;;  %1478 = vrcp.f32 %v953_v6  ;;  %v935_v41 = vadd.f32 %v903_v50, %v839_v59  ;;  %v780_v55 = vmul.f32 2.0, %v1467_v28 }
 0x146   : > { %v823_v37 = vsel %vm759_vm15, 1.0, %v727_v53  ;;  %v887_v58 = vmul.f32 2.0, %v727_v53  ;;  %v812_v61 = vsel %vm748_vm0, 1.0, %v716_v35  ;;  %v876_v44 = vmul.f32 2.0, %v716_v35 }
 0x147   : > { %1480 = vrcp.f32 %v935_v41  ;;  %v855_v0 = vadd.f32 %v823_v37, %v791_v4  ;;  %v844_v39 = vadd.f32 %v812_v61, %v780_v55  ;;  %v732_v9 = vmul.f32 %v1469_v30, %v1469_v30 }
 0x148   : > { %v919_v13 = vsel %vm759_vm15, %v887_v58, 2.0  ;;  %v908_v8 = vsel %vm748_vm0, %v876_v44, 2.0  ;;  %v796_v60 = vmul.f32 2.0, %v1469_v30  ;;  %1482 = vpow2.f32 %v690_v32 }
 0x149   : > { %v982_v57 = vmul.f32 %v854_v49, %v1801_v16  ;;  %v951_v18 = vadd.f32 %v919_v13, %v855_v0  ;;  %v940_v31 = vadd.f32 %v908_v8, %v844_v39  ;;  %v828_v14 = vsel %vm764_vm1, 1.0, %v732_v9 }
 0x14a   : > { %v1471_v17 = vpop.eup %1470  ;;  %v892_v23 = vmul.f32 2.0, %v732_v9  ;;  %vm746_vm2 = vcmp.ge.f32.partialorder %v1948_v47, 0.0  ;;  %v860_v27 = vadd.f32 %v828_v14, %v796_v60  ;;  %v589_v54 = vand.u32 2147483647, %v1997_v22 }
 0x14b   : > { %v1473_v21 = vpop.eup %1472  ;;  %v1003_v5 = vmul.f32 %v1471_v17, %v966_v56  ;;  %1484 = vrcp.f32 %v951_v18  ;;  %v969_v16 = vmul.f32 %v1981_v7, %v1817_v29  ;;  %v2019_v51 = vadd.f32 %v1824_v38, %v1750_v24 }
 0x14c   : > { %v1035_v40 = vmul.f32 %v1473_v21, %v982_v57  ;;  %v1475_v48 = vpop.eup %1474  ;;  %1486 = vrcp.f32 %v940_v31  ;;  %v924_v49 = vsel %vm764_vm1, %v892_v23, 2.0  ;;  %v985_v3 = vmul.f32 %v857_v1, %v1820_v36 }
 0x14d   : > { %1062 = vst [vmem:[%s1907_s7 + $0x20] sm:$0xff] %v1003_v5  ;;  %v1477_v52 = vpop.eup %1476  ;;  %v956_v15 = vadd.f32 %v924_v49, %v860_v27  ;;  %v714_v26 = vmul.f32 %v1475_v48, %v1475_v48  ;;  %v778_v28 = vmul.f32 2.0, %v1475_v48  ;;  %v967_v32 = vmul.f32 %v839_v59, %v1914_v25 }
 0x14e   : > { %1078 = vst [vmem:[%s1907_s7 + $0xa0] sm:$0xff] %v1035_v40  ;;  %v1009_v6 = vmul.f32 %v1477_v52, %v969_v16  ;;  %v621_v50 = vsub.f32 0.0, %v589_v54  ;;  %v605_v29 = vand.u32 2147483647, %v2019_v51  ;;  %v2029_v4 = vadd.f32 %v1750_v24, %v1829_v45 }
 0x14f   : > { %v1479_v7 = vpop.eup %1478  ;;  %1488 = vrcp.f32 %v956_v15  ;;  %v810_v38 = vsel %vm746_vm2, 1.0, %v714_v26  ;;  %v874_v53 = vmul.f32 2.0, %v714_v26  ;;  %v983_v59 = vmul.f32 %v855_v0, %v1935_v42 }
 0x150   : > { %1065 = vst [vmem:[%s1907_s7 + $0x38] sm:$0xff] %v1009_v6  ;;  %v1041_v36 = vmul.f32 %v1479_v7, %v985_v3  ;;  %v842_v1 = vadd.f32 %v810_v38, %v778_v28  ;;  %v664_v35 = vmul.f32 1.442695, %v621_v50  ;;  %v637_v30 = vsub.f32 0.0, %v605_v29 }
 0x151   : > { %v1481_v25 = vpop.eup %1480  ;;  %v906_v56 = vsel %vm746_vm2, %v874_v53, 2.0  ;;  %v587_v41 = vand.u32 2147483647, %v2029_v4  ;;  %v2038_v55 = vadd.f32 %v1750_v24, %v1831_v46  ;;  %v972_v58 = vmul.f32 %v844_v39, %v1940_v2 }
 0x152   : > { %v1483_v45 = vpop.eup %1482  ;;  %1081 = vst [vmem:[%s1907_s7 + $0xb8] sm:$0xff] %v1041_v36  ;;  %v1005_v37 = vmul.f32 %v1481_v25, %v967_v32  ;;  %v938_v61 = vadd.f32 %v906_v56, %v842_v1  ;;  %1490 = vpow2.f32 %v664_v35  ;;  %v696_v13 = vmul.f32 1.442695, %v637_v30 }
 0x153   : > { %v730_v44 = vmul.f32 %v1483_v45, %v1483_v45  ;;  %v794_v9 = vmul.f32 2.0, %v1483_v45  ;;  %v619_v42 = vsub.f32 0.0, %v587_v41  ;;  %vm762_vm3 = vcmp.ge.f32.partialorder %v1961_v43, 0.0 }
 0x154   : > { %1063 = vst [vmem:[%s1907_s7 + $0x28] sm:$0xff] %v1005_v37  ;;  %1492 = vrcp.f32 %v938_v61  ;;  %v603_v0 = vand.u32 2147483647, %v2038_v55  ;;  %v2047_v46 = vadd.f32 %v1842_v62, %v1750_v24  ;;  %v988_v23 = vmul.f32 %v860_v27, %v1944_v12 }
 0x155   : > { %v1485_v8 = vpop.eup %1484  ;;  %v826_v60 = vsel %vm762_vm3, 1.0, %v730_v44  ;;  %v890_v2 = vmul.f32 2.0, %v730_v44  ;;  %1494 = vpow2.f32 %v696_v13  ;;  %v660_v39 = vmul.f32 1.442695, %v619_v42 }
 0x156   : > { %v1487_v17 = vpop.eup %1486  ;;  %v1037_v57 = vmul.f32 %v1485_v8, %v983_v59  ;;  %v858_v18 = vadd.f32 %v826_v60, %v794_v9  ;;  %v635_v31 = vsub.f32 0.0, %v603_v0  ;;  %v592_v21 = vand.u32 2147483647, %v2047_v46 }
 0x157   : > { %v1015_v5 = vmul.f32 %v1487_v17, %v972_v58  ;;  %v922_v14 = vsel %vm762_vm3, %v890_v2, 2.0  ;;  %1496 = vpow2.f32 %v660_v39  ;;  %v2055_v16 = vadd.f32 %v1844_v63, %v1750_v24 }
 0x158   : > { %1079 = vst [vmem:[%s1907_s7 + $0xa8] sm:$0xff] %v1037_v57  ;;  %v954_v62 = vadd.f32 %v922_v14, %v858_v18  ;;  %v692_v40 = vmul.f32 1.442695, %v635_v31  ;;  %v624_v54 = vsub.f32 0.0, %v592_v21  ;;  %v2059_v49 = vadd.f32 %v1750_v24, %v1852_v10 }
 0x159   : > { %v1489_v48 = vpop.eup %1488  ;;  %1068 = vst [vmem:[%s1907_s7 + $0x50] sm:$0xff] %v1015_v5  ;;  %v2063_v52 = vadd.f32 %v1750_v24, %v1854_v11  ;;  %v608_v27 = vand.u32 2147483647, %v2055_v16  ;;  %v970_v63 = vmul.f32 %v842_v1, %v1948_v47  ;;  %vm749_vm4 = vcmp.ge.f32.partialorder %v1997_v22, 0.0 }
 0x15a   : > { %v1047_v3 = vmul.f32 %v1489_v48, %v988_v23  ;;  %1498 = vrcp.f32 %v954_v62  ;;  %v670_v12 = vmul.f32 1.442695, %v624_v54  ;;  %v590_v15 = vand.u32 2147483647, %v2059_v49 }
 0x15b   : > { %1500 = vpow2.f32 %v692_v40  ;;  %v606_v10 = vand.u32 2147483647, %v2063_v52  ;;  %v640_v6 = vsub.f32 0.0, %v608_v27  ;;  %vm765_vm5 = vcmp.ge.f32.partialorder %v2019_v51, 0.0 }
 0x15c   : > { %v1491_v26 = vpop.eup %1490  ;;  %1084 = vst [vmem:[%s1907_s7 + $0xd0] sm:$0xff] %v1047_v3  ;;  %1502 = vpow2.f32 %v670_v12  ;;  %v622_v32 = vsub.f32 0.0, %v590_v15  ;;  %vm747_vm6 = vcmp.ge.f32.partialorder %v2029_v4, 0.0  ;;  %v2075_v29 = vadd.f32 %v1858_v19, %v1750_v24 }
 0x15d   : > { %v717_v28 = vmul.f32 %v1491_v26, %v1491_v26  ;;  %v781_v11 = vmul.f32 2.0, %v1491_v26  ;;  %v2079_v47 = vadd.f32 %v1860_v20, %v1750_v24  ;;  %vm763_vm7 = vcmp.ge.f32.partialorder %v2038_v55, 0.0 }
 0x15e   : > { %v1493_v50 = vpop.eup %1492  ;;  %v702_v1 = vmul.f32 1.442695, %v640_v6  ;;  %v666_v59 = vmul.f32 1.442695, %v622_v32  ;;  %v986_v19 = vmul.f32 %v858_v18, %v1961_v43  ;;  %v638_v20 = vsub.f32 0.0, %v606_v10 }
 0x15f   : > { %v1495_v7 = vpop.eup %1494  ;;  %v1011_v38 = vmul.f32 %v1493_v50, %v970_v63  ;;  %v813_v53 = vsel %vm749_vm4, 1.0, %v717_v28  ;;  %v877_v36 = vmul.f32 2.0, %v717_v28  ;;  %v593_v58 = vand.u32 2147483647, %v2075_v29 }
 0x160   : > { %v845_v35 = vadd.f32 %v813_v53, %v781_v11  ;;  %v733_v30 = vmul.f32 %v1495_v7, %v1495_v7  ;;  %v797_v25 = vmul.f32 2.0, %v1495_v7  ;;  %1504 = vpow2.f32 %v702_v1 }
 0x161   : > { %v1497_v56 = vpop.eup %1496  ;;  %1066 = vst [vmem:[%s1907_s7 + $0x40] sm:$0xff] %v1011_v38  ;;  %v909_v24 = vsel %vm749_vm4, %v877_v36, 2.0  ;;  %1506 = vpow2.f32 %v666_v59  ;;  %vm752_vm8 = vcmp.ge.f32.partialorder %v2047_v46, 0.0  ;;  %v609_v42 = vand.u32 2147483647, %v2079_v47 }
 0x162   : > { %v941_v41 = vadd.f32 %v909_v24, %v845_v35  ;;  %v829_v45 = vsel %vm765_vm5, 1.0, %v733_v30  ;;  %v893_v37 = vmul.f32 2.0, %v733_v30  ;;  %v715_v44 = vmul.f32 %v1497_v56, %v1497_v56 }
 0x163   : > { %v861_v61 = vadd.f32 %v829_v45, %v797_v25  ;;  %v779_v9 = vmul.f32 2.0, %v1497_v56  ;;  %vm768_vm9 = vcmp.ge.f32.partialorder %v2055_v16, 0.0  ;;  %v698_v39 = vmul.f32 1.442695, %v638_v20 }
 0x164   : > { %v1499_v13 = vpop.eup %1498  ;;  %1508 = vrcp.f32 %v941_v41  ;;  %v925_v43 = vsel %vm765_vm5, %v893_v37, 2.0  ;;  %v811_v2 = vsel %vm747_vm6, 1.0, %v715_v44  ;;  %v875_v18 = vmul.f32 2.0, %v715_v44 }
 0x165   : > { %v1501_v0 = vpop.eup %1500  ;;  %v1043_v8 = vmul.f32 %v1499_v13, %v986_v19  ;;  %v957_v60 = vadd.f32 %v925_v43, %v861_v61  ;;  %v2098_v57 = vadd.f32 %v811_v2, %v779_v9  ;;  %vm750_vm10 = vcmp.ge.f32.partialorder %v2059_v49, 0.0 }
 0x166   : > { %v1503_v17 = vpop.eup %1502  ;;  %v731_v31 = vmul.f32 %v1501_v0, %v1501_v0  ;;  %v795_v21 = vmul.f32 2.0, %v1501_v0  ;;  %v625_v23 = vsub.f32 0.0, %v593_v58  ;;  %v907_v62 = vsel %vm747_vm6, %v875_v18, 2.0 }
 0x167   : > { %1082 = vst [vmem:[%s1907_s7 + $0xc0] sm:$0xff] %v1043_v8  ;;  %1510 = vrcp.f32 %v957_v60  ;;  %v720_v5 = vmul.f32 %v1503_v17, %v1503_v17  ;;  %v784_v14 = vmul.f32 2.0, %v1503_v17  ;;  %v641_v48 = vsub.f32 0.0, %v609_v42 }
 0x168   : > { %v827_v40 = vsel %vm763_vm7, 1.0, %v731_v31  ;;  %v891_v54 = vmul.f32 2.0, %v731_v31  ;;  %v939_v3 = vadd.f32 %v907_v62, %v2098_v57  ;;  %v973_v26 = vmul.f32 %v845_v35, %v1997_v22  ;;  %v1542_v22 = vld [vmem:[%s2225_s2] ss:$0 sm:$0xff] }
 0x169   : > { %v859_v12 = vadd.f32 %v827_v40, %v795_v21  ;;  %v816_v27 = vsel %vm752_vm8, 1.0, %v720_v5  ;;  %v880_v15 = vmul.f32 2.0, %v720_v5  ;;  %1512 = vpow2.f32 %v698_v39 }
 0x16a   : > { %v923_v63 = vsel %vm763_vm7, %v891_v54, 2.0  ;;  %v848_v10 = vadd.f32 %v816_v27, %v784_v14  ;;  %v1505_v28 = vpop.eup %1504  ;;  %1514 = vrcp.f32 %v939_v3  ;;  %v672_v32 = vmul.f32 1.442695, %v625_v23 }
 0x16b   : > { %v955_v11 = vadd.f32 %v923_v63, %v859_v12  ;;  %v912_v6 = vsel %vm752_vm8, %v880_v15, 2.0  ;;  %v736_v7 = vmul.f32 %v1505_v28, %v1505_v28  ;;  %v800_v38 = vmul.f32 2.0, %v1505_v28  ;;  %v1507_v36 = vpop.eup %1506 }
 0x16c   : > { %v944_v50 = vadd.f32 %v912_v6, %v848_v10  ;;  %v704_v53 = vmul.f32 1.442695, %v641_v48  ;;  %v989_v1 = vmul.f32 %v861_v61, %v2019_v51  ;;  %v2119_v35 = vadd.f32 %v1542_v22, %v1867_v33 }
 0x16d   : > { %1516 = vrcp.f32 %v955_v11  ;;  %v2122_v30 = vadd.f32 %v1542_v22, %v1869_v34  ;;  %v832_v59 = vsel %vm768_vm9, 1.0, %v736_v7  ;;  %v896_v56 = vmul.f32 2.0, %v736_v7 }
 0x16e   : > { %v1509_v25 = vpop.eup %1508  ;;  %1518 = vrcp.f32 %v944_v50  ;;  %v718_v19 = vmul.f32 %v1507_v36, %v1507_v36  ;;  %v864_v24 = vadd.f32 %v832_v59, %v800_v38  ;;  %v782_v20 = vmul.f32 2.0, %v1507_v36 }
 0x16f   : > { %v1017_v51 = vmul.f32 %v1509_v25, %v973_v26  ;;  %1520 = vpow2.f32 %v672_v32  ;;  %v928_v41 = vsel %vm768_vm9, %v896_v56, 2.0  ;;  %v591_v61 = vand.u32 2147483647, %v2119_v35 }
 0x170   : > { %v814_v33 = vsel %vm750_vm10, 1.0, %v718_v19  ;;  %v878_v34 = vmul.f32 2.0, %v718_v19  ;;  %1522 = vpow2.f32 %v704_v53  ;;  %v960_v37 = vadd.f32 %v928_v41, %v864_v24 }
 0x171   : > { %v1511_v45 = vpop.eup %1510  ;;  %1069 = vst [vmem:[%s1907_s7 + $0x58] sm:$0xff] %v1017_v51  ;;  %v846_v58 = vadd.f32 %v814_v33, %v782_v20  ;;  %v607_v13 = vand.u32 2147483647, %v2122_v30  ;;  %v623_v42 = vsub.f32 0.0, %v591_v61  ;;  %v971_v8 = vmul.f32 %v2098_v57, %v2029_v4 }
 0x172   : > { %v1049_v44 = vmul.f32 %v1511_v45, %v989_v1  ;;  %v910_v9 = vsel %vm750_vm10, %v878_v34, 2.0  ;;  %1524 = vrcp.f32 %v960_v37  ;;  %v987_v21 = vmul.f32 %v859_v12, %v2038_v55 }
 0x173   : > { %v942_v43 = vadd.f32 %v910_v9, %v846_v58  ;;  %v1513_v0 = vpop.eup %1512  ;;  %v639_v60 = vsub.f32 0.0, %v607_v13  ;;  %v668_v18 = vmul.f32 1.442695, %v623_v42  ;;  %vm766_vm11 = vcmp.ge.f32.partialorder %v2063_v52, 0.0 }
 0x174   : > { %1085 = vst [vmem:[%s1907_s7 + $0xd8] sm:$0xff] %v1049_v44  ;;  %v1515_v2 = vpop.eup %1514  ;;  %v734_v39 = vmul.f32 %v1513_v0, %v1513_v0  ;;  %v798_v17 = vmul.f32 2.0, %v1513_v0  ;;  %v976_v23 = vmul.f32 %v848_v10, %v2047_v46  ;;  %vm753_vm12 = vcmp.ge.f32.partialorder %v2075_v29, 0.0 }
 0x175   : > { %1526 = vrcp.f32 %v942_v43  ;;  %v1013_v31 = vmul.f32 %v1515_v2, %v971_v8  ;;  %v700_v5 = vmul.f32 1.442695, %v639_v60  ;;  %vm769_vm13 = vcmp.ge.f32.partialorder %v2079_v47, 0.0 }
 0x176   : > { %v830_v62 = vsel %vm766_vm11, 1.0, %v734_v39  ;;  %v894_v4 = vmul.f32 2.0, %v734_v39  ;;  %1528 = vpow2.f32 %v668_v18  ;;  %v992_v10 = vmul.f32 %v864_v24, %v2055_v16 }
 0x177   : > { %v1517_v14 = vpop.eup %1516  ;;  %1067 = vst [vmem:[%s1907_s7 + $0x48] sm:$0xff] %v1013_v31  ;;  %v862_v54 = vadd.f32 %v830_v62, %v798_v17  ;;  %1530 = vpow2.f32 %v700_v5  ;;  %v974_v53 = vmul.f32 %v846_v58, %v2059_v49  ;;  %vm751_vm14 = vcmp.ge.f32.partialorder %v2119_v35, 0.0 }
 0x178   : > { %v1519_v57 = vpop.eup %1518  ;;  %v1045_v40 = vmul.f32 %v1517_v14, %v987_v21  ;;  %v926_v27 = vsel %vm766_vm11, %v894_v4, 2.0  ;;  %vm767_vm15 = vcmp.ge.f32.partialorder %v2122_v30, 0.0 }
 0x179   : > { %v1521_v48 = vpop.eup %1520  ;;  %v1023_v3 = vmul.f32 %v1519_v57, %v976_v23  ;;  %v958_v12 = vadd.f32 %v926_v27, %v862_v54  ;;  %v990_v45 = vmul.f32 %v862_v54, %v2063_v52 }
 0x17a   : > { %v1523_v55 = vpop.eup %1522  ;;  %1083 = vst [vmem:[%s1907_s7 + $0xc8] sm:$0xff] %v1045_v40  ;;  %v721_v15 = vmul.f32 %v1521_v48, %v1521_v48  ;;  %v785_v26 = vmul.f32 2.0, %v1521_v48 }
 0x17b   : > { %1072 = vst [vmem:[%s1907_s7 + $0x70] sm:$0xff] %v1023_v3  ;;  %v737_v46 = vmul.f32 %v1523_v55, %v1523_v55  ;;  %v801_v63 = vmul.f32 2.0, %v1523_v55  ;;  %1532 = vrcp.f32 %v958_v12 }
 0x17c   : > { %v817_v28 = vsel %vm753_vm12, 1.0, %v721_v15  ;;  %v881_v11 = vmul.f32 2.0, %v721_v15  ;;  %v1525_v6 = vpop.eup %1524 }
 0x17d   : > { %v849_v32 = vadd.f32 %v817_v28, %v785_v26  ;;  %v833_v50 = vsel %vm769_vm13, 1.0, %v737_v46  ;;  %v897_v7 = vmul.f32 2.0, %v737_v46  ;;  %v1055_v38 = vmul.f32 %v1525_v6, %v992_v10 }
 0x17e   : > { %v913_v36 = vsel %vm753_vm12, %v881_v11, 2.0  ;;  %v865_v1 = vadd.f32 %v833_v50, %v801_v63 }
 0x17f   : > { %v1527_v22 = vpop.eup %1526  ;;  %v945_v25 = vadd.f32 %v913_v36, %v849_v32  ;;  %v929_v16 = vsel %vm769_vm13, %v897_v7, 2.0  ;;  %1088 = vst [vmem:[%s1907_s7 + $0xf0] sm:$0xff] %v1055_v38  ;;  %v977_v60 = vmul.f32 %v849_v32, %v2075_v29 }
 0x180   : > { %v1019_v59 = vmul.f32 %v1527_v22, %v974_v53  ;;  %v961_v56 = vadd.f32 %v929_v16, %v865_v1  ;;  %v1529_v19 = vpop.eup %1528  ;;  %v993_v2 = vmul.f32 %v865_v1, %v2079_v47 }
 0x181   : > { %1534 = vrcp.f32 %v945_v25  ;;  %v1531_v51 = vpop.eup %1530  ;;  %v719_v24 = vmul.f32 %v1529_v19, %v1529_v19  ;;  %v783_v20 = vmul.f32 2.0, %v1529_v19 }
 0x182   : > { %1070 = vst [vmem:[%s1907_s7 + $0x60] sm:$0xff] %v1019_v59  ;;  %1536 = vrcp.f32 %v961_v56  ;;  %v735_v49 = vmul.f32 %v1531_v51, %v1531_v51  ;;  %v799_v41 = vmul.f32 2.0, %v1531_v51 }
 0x183   : > { %v815_v33 = vsel %vm751_vm14, 1.0, %v719_v24  ;;  %v879_v34 = vmul.f32 2.0, %v719_v24 }
 0x184   : > { %v847_v37 = vadd.f32 %v815_v33, %v783_v20  ;;  %v831_v58 = vsel %vm767_vm15, 1.0, %v735_v49  ;;  %v895_v61 = vmul.f32 2.0, %v735_v49 }
 0x185   : > { %v1533_v44 = vpop.eup %1532  ;;  %v911_v9 = vsel %vm751_vm14, %v879_v34, 2.0  ;;  %v863_v13 = vadd.f32 %v831_v58, %v799_v41 }
 0x186   : > { %v1051_v43 = vmul.f32 %v1533_v44, %v990_v45  ;;  %v943_v42 = vadd.f32 %v911_v9, %v847_v37  ;;  %v927_v0 = vsel %vm767_vm15, %v895_v61, 2.0  ;;  %v975_v31 = vmul.f32 %v847_v37, %v2119_v35 }
 0x187   : > { %v959_v8 = vadd.f32 %v927_v0, %v863_v13  ;;  %v991_v29 = vmul.f32 %v863_v13, %v2122_v30 }
 0x188   : > { %1086 = vst [vmem:[%s1907_s7 + $0xe0] sm:$0xff] %v1051_v43  ;;  %1538 = vrcp.f32 %v943_v42 }
 0x189   : > { %1540 = vrcp.f32 %v959_v8 }
 0x18b   : > { %v1535_v52 = vpop.eup %1534 }
 0x18c   : > { %v1537_v39 = vpop.eup %1536  ;;  %v1025_v17 = vmul.f32 %v1535_v52, %v977_v60 }
 0x18d   : > { %v1057_v18 = vmul.f32 %v1537_v39, %v993_v2 }
 0x18e   : > { %1073 = vst [vmem:[%s1907_s7 + $0x78] sm:$0xff] %v1025_v17 }
 0x18f   : > { %1089 = vst [vmem:[%s1907_s7 + $0xf8] sm:$0xff] %v1057_v18 }
 0x192   : > { %v1539_v21 = vpop.eup %1538 }
 0x193   : > { %v1541_v5 = vpop.eup %1540  ;;  %v1021_v14 = vmul.f32 %v1539_v21, %v975_v31 }
 0x194   : > { %v1053_v47 = vmul.f32 %v1541_v5, %v991_v29 }
 0x195   : > { %1071 = vst [vmem:[%s1907_s7 + $0x68] sm:$0xff] %v1021_v14 }
 0x196   : > { %1087 = vst [vmem:[%s1907_s7 + $0xe8] sm:$0xff] %v1053_v47 }
 0x197   : > { %1556 = shalt.err (!%p1553_p5)
}
 0x198   : > { %s1557_s29 = scalar_lea.hbm %s2169_s21, 4096  ;;  %s1561_s5 = scalar_lea.hbm %s2226_s3, 8192 }
 0x199   : > { %p1558_p6 = scmp.ne.s32.totalorder %s2169_s21, %s1557_s29  ;;  %p1562_p10 = scmp.lt.u32.totalorder %s2169_s21, %s2226_s3 }
 0x19a   : > { %p1563_p11 = scmp.lt.u32.totalorder %s1561_s5, %s1557_s29  ;;  %p1565_p13 = scmp.lt.u32.totalorder %s1557_s29, %s2169_s21 }
 0x19b   : > { %p1559_p7 = pnand %p1558_p6, %p1686_p4 }
 0x19c   : > { %p1564_p12 = por %p1563_p11, %p1562_p10 }
 0x19d   : > { %p1560_p9 = pneg %p1559_p7 }
 0x19e   : > { %p1566_p0 = por %p1565_p13, %p1564_p12 }
 0x1a0   : > { %p1567_p1 = pnand %p1566_p0, %p1560_p9 }
 0x1a2   : > { %1570 = shalt.err (!%p1567_p1)
}
 0x1a3   : > { %s1624_s8 = smov 128   ;;  %s1625_s9 = smov 8  }
 0x1a4   : > { %1333 = dma.vmem_to_hbm [thread:$0]  (%p1686_p4), %s2171_s11, 4096, %s2169_s21, %s2177_s15, %s1624_s8, %s1624_s8, %s1625_s9  }
 0x1a5 PF: > { %p1339_p2 = scmp.ge.s32.totalorder %s1621_s17, 2  ;;  %s1120_s10 = sand.u32 1, %s1601_s12  }
 0x1a6   : > { %s1121_s18 = scalar_lea.sflag [#allocation3], %s1120_s10 }
 0x1a7   : > { %p1336_p3 = pnand %p1339_p2, %p1693_p8 }
 0x1a9   : > { %1596 = dma.done.wait (!%p1336_p3), %s1121_s18, 4096  }
 0x1aa   : > { %1598 = vsyncadd (!%p1336_p3), %s1121_s18, 4294963200  ;;  %s16_s17 = sadd.s32 1, %s1621_s17   ;;  %s2229_s12 = smov %s1605_s13 }
 0x1ab   : > { %p13_p5 = scmp.ge.s32.totalorder %s16_s17, 4   ;;  %s2230_s13 = smov %s1609_s14 }
 0x1ac   : > { %s2231_s14 = smov %s1699_s25  ;;  %s2232_s15 = smov %s1617_s16 }
 0x1ad   : > { %s2233_s16 = smov %s2235_s20  ;;  %15 = sbr.rel (!%p13_p5) target bundleno = 4 (0x4), region = 73 }
 0x1b4   :  { %1126 = vsyncpa [#allocation3], 1 }
 0x1b5   :  { %1128 = vsyncpa [#allocation3 + $0x1], 1 }

</bundles_post_ra>
